<compile_context>
chip_gen: v5e
topology: v5e:2x2
jax: 0.10.0
libtpu: 0.0.40
codegen_flags: <defaults>
</compile_context>

<pallas_src>
import functools
import math

import jax
import jax.numpy as jnp
from jax.experimental import pallas as pl
from jax.experimental.pallas import tpu as pltpu


def _approx_kernel(alpha, g_hd, x_ref, w_ref, b_ref, out_ref):
    """One grid step == one tile of packed rows.

    x_ref   : (RT, g*K)      packed features (g original rows per packed row)
    w_ref   : (g*K, 3*g*Hd)  fused block-diagonal weight (resident, Wth folded)
    b_ref   : (1, 3*g*Hd)    fused bias
    out_ref : (RT, g*Hd)     lane-dense output tile (no padding lanes)
    """
    # Single fused MXU push producing spatial / temporal-pre-tanh / contextual
    # side by side for all g row-group members, then one bias-row add.
    y = jnp.dot(x_ref[...], w_ref[...], preferred_element_type=jnp.float32)
    y = y + b_ref[...]

    spatial = y[:, 0:g_hd]
    temporal = jnp.tanh(y[:, g_hd:2 * g_hd])         # EUP slot
    contextual = y[:, 2 * g_hd:3 * g_hd]

    # aggregate = mean of the three views, then LeakyReLU(alpha)
    out = (spatial + temporal + contextual) * (1.0 / 3.0)
    out_ref[...] = jnp.where(out > 0, out, alpha * out).astype(out_ref.dtype)


def _pick_pack_factor(hidden, k, n, target_depth=256):
    """Smallest g with g*hidden % 128 == 0, doubled while the contraction
    depth g*k stays <= target_depth and g still divides n."""
    g = 128 // math.gcd(hidden, 128)
    while (2 * g * k <= target_depth) and (n % (2 * g) == 0):
        g *= 2
    return g


def _choose_row_tile(r):
    """Largest VMEM-safe candidate tile dividing r; if none divides, pad r up
    to a multiple of 8 (never emit one monolithic full-R block)."""
    cands = (2048, 1024, 512, 256, 128, 64, 32, 16, 8)
    for c in cands:
        if r % c == 0:
            return c, r
    if r < 8:
        return r, r                       # full-dim block is layout-legal
    r_pad = ((r + 7) // 8) * 8
    for c in cands:
        if r_pad % c == 0:
            return c, r_pad
    return 8, r_pad


def approximate_model_forward(qa_val, mete_val, ctx_val, params, alpha=0.2,
                              mxu_depth=256):
    """qa_val:   (T,  B, H, W, Fq)
       mete_val: (2T, B, H, W, Fm)
       ctx_val:  (2T, B, H, W, Fc)
       returns   (T,  B, H, W, hidden)

       mxu_depth: target MXU contraction depth for row-group packing
                  (256 for v6e/v7x, pass 128 on v5e)."""
    T, B, H, W, Fq = qa_val.shape
    Fm = mete_val.shape[-1]
    Fc = ctx_val.shape[-1]
    Ws, bs, Wtm, Wtc, Wth, bt, Wc, bc = params
    Hd = Ws.shape[-1]
    N = B * H * W
    K = Fq + Fm + Fc + Fc
    f32 = jnp.float32

    qa3 = qa_val.reshape(T, N, Fq).astype(f32)
    mete3 = mete_val.reshape(2 * T, N, Fm).astype(f32)
    ctx3 = ctx_val.reshape(2 * T, N, Fc).astype(f32)

    # ---- window means via prefix sums (single pass over mete/ctx) ---------
    # mean(x[t:t+T]) == (csum[t+T-1] - csum[t-1]) / T  with csum[-1] := 0
    inv_T = 1.0 / T
    csum_m = jnp.cumsum(mete3, axis=0)
    csum_c = jnp.cumsum(ctx3, axis=0)
    mean_m = (csum_m[T - 1:2 * T - 1]
              - jnp.concatenate([jnp.zeros((1, N, Fm), f32),
                                 csum_m[:T - 1]], axis=0)) * inv_T
    mean_c = (csum_c[T - 1:2 * T - 1]
              - jnp.concatenate([jnp.zeros((1, N, Fc), f32),
                                 csum_c[:T - 1]], axis=0)) * inv_T

    # ---- ONE packed slab (no zero blocks) ----------------------------------
    # p[t, n] = [qa[t,n], mean(mete[t:t+T],n), mean(ctx[t:t+T],n), ctx[t+T,n]]
    p = jnp.concatenate([qa3, mean_m, mean_c, ctx3[T:2 * T]], axis=-1)  # (T,N,K)

    # ---- row-group lane packing --------------------------------------------
    g = _pick_pack_factor(Hd, K, N, target_depth=mxu_depth)
    if N % g:
        N_pad = pl.cdiv(N, g) * g
        p = jnp.pad(p, ((0, 0), (0, N_pad - N), (0, 0)))
    else:
        N_pad = N
    Ng = N_pad // g
    gK, gHd = g * K, g * Hd
    R = T * Ng
    p = p.reshape(R, gK)                    # no-copy row-major reshape

    RT, R_pad = _choose_row_tile(R)
    if R_pad != R:
        p = jnp.pad(p, ((0, R_pad - R), (0, 0)))

    # ---- fused block-diagonal weight / bias --------------------------------
    # per-row view blocks (K, Hd); Wth folded into the qa rows of the temporal
    # block so all contributions are independent (one MXU push, no chain).
    wv_s = jnp.zeros((K, Hd), f32).at[0:Fq].set(Ws)
    wv_t = (jnp.zeros((K, Hd), f32)
            .at[0:Fq].set(Ws @ Wth)
            .at[Fq:Fq + Fm].set(Wtm)
            .at[Fq + Fm:Fq + Fm + Fc].set(Wtc))
    wv_c = jnp.zeros((K, Hd), f32).at[Fq + Fm + Fc:K].set(Wc)
    eye_g = jnp.eye(g, dtype=f32)
    W_blk = jnp.concatenate([jnp.kron(eye_g, wv_s),
                             jnp.kron(eye_g, wv_t),
                             jnp.kron(eye_g, wv_c)], axis=-1)   # (gK, 3*gHd)
    b_blk = jnp.concatenate([jnp.tile(bs.reshape(1, Hd), (1, g)),
                             jnp.tile((bs @ Wth + bt).reshape(1, Hd), (1, g)),
                             jnp.tile(bc.reshape(1, Hd), (1, g))],
                            axis=-1)                            # (1, 3*gHd)

    kernel = functools.partial(_approx_kernel, alpha, gHd)

    grid_spec = pltpu.PrefetchScalarGridSpec(
        num_scalar_prefetch=0,
        grid=(R_pad // RT,),
        in_specs=[
            pl.BlockSpec((RT, gK), lambda r: (r, 0)),           # packed slab
            pl.BlockSpec((gK, 3 * gHd), lambda r: (0, 0)),      # fused W (resident)
            pl.BlockSpec((1, 3 * gHd), lambda r: (0, 0)),       # fused b (resident)
        ],
        out_specs=pl.BlockSpec((RT, gHd), lambda r: (r, 0)),
    )

    out = pl.pallas_call(
        kernel,
        out_shape=jax.ShapeDtypeStruct((R_pad, gHd), f32),
        grid_spec=grid_spec,
        compiler_params=pltpu.CompilerParams(
            dimension_semantics=("parallel",),
            vmem_limit_bytes=32 * 1024 * 1024),
    )(p, W_blk, b_blk)

    # unpack row groups (no-copy reshapes; slices only when padding was used)
    if R_pad != R:
        out = out[:R]
    out = out.reshape(T, N_pad, Hd)
    if N_pad != N:
        out = out[:, :N]
    return out.reshape(T, B, H, W, Hd)


def reference_forward(qa_val, mete_val, ctx_val, params, alpha=0.2):
    """Pure-JAX reference of the same forward pass (direct window means)."""
    T, B, H, W, Fq = qa_val.shape
    Ws, bs, Wtm, Wtc, Wth, bt, Wc, bc = params
    Hd = Ws.shape[-1]
    N = B * H * W
    qa3 = qa_val.reshape(T, N, Fq)
    mete3 = mete_val.reshape(2 * T, N, -1)
    ctx3 = ctx_val.reshape(2 * T, N, -1)
    spatial_all = qa3 @ Ws + bs                      # (T, N, Hd)
    outs = []
    for t in range(T):
        spatial = spatial_all[t]
        mete_mean = jnp.mean(mete3[t:t + T], axis=0)
        ctx_mean = jnp.mean(ctx3[t:t + T], axis=0)
        temporal = jnp.tanh(mete_mean @ Wtm + ctx_mean @ Wtc
                            + spatial @ Wth + bt)
        contextual = ctx3[t + T] @ Wc + bc
        o = (spatial + temporal + contextual) / 3.0
        o = jnp.where(o > 0, o, alpha * o)
        outs.append(o)
    return jnp.stack(outs).reshape(T, B, H, W, Hd)


def make_params(key, qa_features, mete_features, ctx_features, hidden):
    ks = jax.random.split(key, 8)
    scale = 0.1
    Ws = scale * jax.random.normal(ks[0], (qa_features, hidden), jnp.float32)
    bs = scale * jax.random.normal(ks[1], (1, hidden), jnp.float32)
    Wtm = scale * jax.random.normal(ks[2], (mete_features, hidden), jnp.float32)
    Wtc = scale * jax.random.normal(ks[3], (ctx_features, hidden), jnp.float32)
    Wth = scale * jax.random.normal(ks[4], (hidden, hidden), jnp.float32)
    bt = scale * jax.random.normal(ks[5], (1, hidden), jnp.float32)
    Wc = scale * jax.random.normal(ks[6], (ctx_features, hidden), jnp.float32)
    bc = scale * jax.random.normal(ks[7], (1, hidden), jnp.float32)
    return (Ws, bs, Wtm, Wtc, Wth, bt, Wc, bc)


if __name__ == "__main__":
    # small shapes consistent with the module defaults
    T = 4                 # time window length
    B = 2                 # batch
    H, W = 8, 8           # map_size
    Fq = Fm = Fc = 7      # qa / mete / ctx features
    HIDDEN = 32

    key = jax.random.PRNGKey(0)
    k_qa, k_me, k_cx, k_p = jax.random.split(key, 4)

    # qa has T steps; mete/ctx need 2T steps because the forward reads
    # mete_val[t:t+T], ctx_val[t:t+T] and ctx_val[t+T].
    qa_val = jax.random.normal(k_qa, (T, B, H, W, Fq), jnp.float32)
    mete_val = jax.random.normal(k_me, (2 * T, B, H, W, Fm), jnp.float32)
    ctx_val = jax.random.normal(k_cx, (2 * T, B, H, W, Fc), jnp.float32)

    params = make_params(k_p, Fq, Fm, Fc, HIDDEN)

    out = approximate_model_forward(qa_val, mete_val, ctx_val, params)
    out = jax.block_until_ready(out)

    ref = jax.block_until_ready(
        reference_forward(qa_val, mete_val, ctx_val, params))

    assert out.shape == (T, B, H, W, HIDDEN), out.shape
    assert jnp.allclose(out, ref, atol=1e-4, rtol=1e-4), (
        float(jnp.max(jnp.abs(out - ref))))

    print("KERNEL_OK")
</pallas_src>

<mosaic_0001>
module attributes {stable_mosaic.version = 11 : i64} {
  func.func @_approx_kernel(%arg0: i32, %arg1: memref<64x224xf32, #tpu.memory_space<vmem>>, %arg2: memref<224x768xf32, #tpu.memory_space<vmem>>, %arg3: memref<1x768xf32, #tpu.memory_space<vmem>>, %arg4: memref<64x256xf32, #tpu.memory_space<vmem>>) attributes {dimension_semantics = [#tpu.dimension_semantics<parallel>], iteration_bounds = array<i64: 1>, scalar_prefetch = 0 : i64, scratch_operands = 0 : i64, tpu.core_type = #tpu.core_type<tc>, window_params = [{transform_indices = @transform_0, window_bounds = array<i64: 64, 224>}, {pipeline_mode = #tpu.pipeline_mode<synchronous>, transform_indices = @transform_1, window_bounds = array<i64: 224, 768>}, {pipeline_mode = #tpu.pipeline_mode<synchronous>, transform_indices = @transform_2, window_bounds = array<i64: 1, 768>}, {transform_indices = @transform_3, window_bounds = array<i64: 64, 256>}]} {
    %c0 = arith.constant 0 : index
    %c0_0 = arith.constant 0 : index
    %0 = vector.load %arg1[%c0, %c0_0] : memref<64x224xf32, #tpu.memory_space<vmem>>, vector<64x224xf32>
    %c0_1 = arith.constant 0 : index
    %c0_2 = arith.constant 0 : index
    %1 = vector.load %arg2[%c0_1, %c0_2] : memref<224x768xf32, #tpu.memory_space<vmem>>, vector<224x768xf32>
    %cst = arith.constant dense<0.000000e+00> : vector<64x768xf32>
    %2 = tpu.matmul %0, %1, %cst {dimension_numbers = #tpu.dot_dimension_numbers<[1], [0], [0], [1], [0, 0, 1, 1], [], []>} : vector<64x224xf32>, vector<224x768xf32>, vector<64x768xf32> -> vector<64x768xf32>
    %c0_3 = arith.constant 0 : index
    %c0_4 = arith.constant 0 : index
    %3 = vector.load %arg3[%c0_3, %c0_4] : memref<1x768xf32, #tpu.memory_space<vmem>>, vector<1x768xf32>
    %4 = vector.broadcast %3 : vector<1x768xf32> to vector<64x768xf32>
    %5 = arith.addf %2, %4 : vector<64x768xf32>
    %6 = vector.extract_strided_slice %5 {offsets = [0, 0], sizes = [64, 256], strides = [1, 1]} : vector<64x768xf32> to vector<64x256xf32>
    %7 = vector.extract_strided_slice %5 {offsets = [0, 256], sizes = [64, 256], strides = [1, 1]} : vector<64x768xf32> to vector<64x256xf32>
    %8 = math.tanh %7 : vector<64x256xf32>
    %9 = vector.extract_strided_slice %5 {offsets = [0, 512], sizes = [64, 256], strides = [1, 1]} : vector<64x768xf32> to vector<64x256xf32>
    %10 = arith.addf %6, %8 : vector<64x256xf32>
    %11 = arith.addf %10, %9 : vector<64x256xf32>
    %cst_5 = arith.constant 0.333333343 : f32
    %12 = vector.broadcast %cst_5 : f32 to vector<64x256xf32>
    %13 = arith.mulf %11, %12 : vector<64x256xf32>
    %cst_6 = arith.constant 0.000000e+00 : f32
    %14 = vector.broadcast %cst_6 : f32 to vector<64x256xf32>
    %15 = arith.cmpf ogt, %13, %14 : vector<64x256xf32>
    %cst_7 = arith.constant 2.000000e-01 : f32
    %16 = vector.broadcast %cst_7 : f32 to vector<64x256xf32>
    %17 = arith.mulf %16, %13 : vector<64x256xf32>
    %18 = arith.select %15, %13, %17 : vector<64x256xi1>, vector<64x256xf32>
    %c0_8 = arith.constant 0 : index
    %c0_9 = arith.constant 0 : index
    %19 = vector.load %arg4[%c0_8, %c0_9] : memref<64x256xf32, #tpu.memory_space<vmem>>, vector<64x256xf32>
    tpu.vector_store %arg4[%c0_8, %c0_9], %18 {strides = array<i32>} : memref<64x256xf32, #tpu.memory_space<vmem>>, vector<64x256xf32>,
    return
  }
  func.func @transform_0(%arg0: i32) -> (i32, i32) {
    %c0_i32 = arith.constant 0 : i32
    %c0_i32_0 = arith.constant 0 : i32
    return %arg0, %c0_i32 : i32, i32
  }
  func.func @transform_1(%arg0: i32) -> (i32, i32) {
    %c0_i32 = arith.constant 0 : i32
    %c0_i32_0 = arith.constant 0 : i32
    %c0_i32_1 = arith.constant 0 : i32
    return %c0_i32, %c0_i32_0 : i32, i32
  }
  func.func @transform_2(%arg0: i32) -> (i32, i32) {
    %c0_i32 = arith.constant 0 : i32
    %c0_i32_0 = arith.constant 0 : i32
    %c0_i32_1 = arith.constant 0 : i32
    return %c0_i32, %c0_i32_0 : i32, i32
  }
  func.func @transform_3(%arg0: i32) -> (i32, i32) {
    %c0_i32 = arith.constant 0 : i32
    %c0_i32_0 = arith.constant 0 : i32
    return %arg0, %c0_i32 : i32, i32
  }
}

</mosaic_0001>

<bundles_post_ra>
// kernel: tpu_custom_call.1
= control target key start
LH: loop header
LB: loop body
LE: loop exit
PB: predicated region body
PF: predicated region fallthrough
CT: control target
= control target key end

     0   :  { %8 = vsyncpa [#allocation3], 0  ;;  %s1508_s0 = inlined_call_operand.hbm [shape: f32[64,224], index: 0, kind: input, shape index: {}]   ;;  %s1509_s1 = inlined_call_operand.hbm [shape: f32[224,768], index: 1, kind: input, shape index: {}]   ;;  %s1510_s2 = inlined_call_operand.hbm [shape: f32[1,768], index: 2, kind: input, shape index: {}]   ;;  %s1511_s3 = inlined_call_operand.hbm [shape: f32[64,256], index: 3, kind: output, shape index: {}]  }
   0x1   :  { %9 = vsyncpa [#allocation6], 0  ;;  %s28_s14 = sshll.u32 %s1509_s1, 4  ;;  %s29_s14 = int_to_ptr.hbm [resolvable:$true] %s28_s14 }
   0x2   :  { %10 = vsyncpa [#allocation4], 0  ;;  %s1113_s15 = smov [#allocation5]   ;;  %s15_s19 = sshll.u32 %s1508_s0, 4  ;;  %s16_s19 = int_to_ptr.hbm [resolvable:$true] %s15_s19 }
   0x3   :  { %s30_s16 = sshll.u32 %s1113_s15, 4  ;;  %s1114_s20 = smov 768   ;;  %s31_s16 = int_to_ptr.vmem [resolvable:$true] %s30_s16 }
   0x4   :  { %s1115_s21 = smov 48   ;;  %s1116_s22 = smov [#allocation2]  }
   0x5   :  { %36 = dma.hbm_to_vmem [thread:$0]  %s29_s14, 21504, %s31_s16, [#allocation6], %s1114_s20, %s1114_s20, %s1115_s21  }
   0x6   :  { %s17_s23 = sshll.u32 %s1116_s22, 4  ;;  %s1117_s24 = smov 256   ;;  %s18_s23 = int_to_ptr.vmem [resolvable:$true] %s17_s23 }
   0x7   :  { %s1118_s25 = smov 16   ;;  %s42_s27 = sshll.u32 %s1510_s2, 4  ;;  %s43_s27 = int_to_ptr.hbm [resolvable:$true] %s42_s27 }
   0x8   :  { %23 = dma.hbm_to_vmem [thread:$0]  %s16_s19, 2048, %s18_s23, [#allocation3], %s1117_s24, %s1117_s24, %s1118_s25  }
   0x9   :  { %s1119_s28 = smov [#allocation7]  }
   0xa   :  { %s44_s0 = sshll.u32 %s1119_s28, 4  ;;  %s45_s0 = int_to_ptr.vmem [resolvable:$true] %s44_s0 }
   0xb   :  { %47 = dma.hbm_to_vmem [thread:$0]  %s43_s27, 96, %s45_s0, [#allocation6]  }
   0xc   :  { %1107 = dma.done.wait [#allocation3], 2048  }
   0xd   :  { %1108 = vsyncadd [#allocation3], 4294965248 }
   0xe   :  { %1109 = dma.done.wait [#allocation6], 21600  }
   0xf   :  { %1110 = vsyncadd [#allocation6], 4294945696  ;;  %v167_v0 = vld [vmem:[#allocation5 + $0x2d8] sm:$0xff]  ;;  %v166_v2 = vld [vmem:[#allocation5 + $0x2d0] sm:$0xff]  ;;  %vm258_vm0 = vcmask 785408   ;;  %s1120_s2 = smov [#allocation8]  }
  0x10   :  { %v239_v1 = vld [vmem:[#allocation5 + $0x518] sm:$0xff]  ;;  %365 = vmatpush.msra.mxu2 %v167_v0  ;;  %v161_v3 = vld [vmem:[#allocation5 + $0x2a8] sm:$0xff]  ;;  %v160_v5 = vld [vmem:[#allocation5 + $0x2a0] sm:$0xff]  ;;  %283 = vmatpush.msra.mxu0 %v166_v2  ;;  %s907_s29 = sshll.u32 %s1120_s2, 4  ;;  %s909_s5 = sshll.u32 %s1511_s3, 4  ;;  %s908_s29 = int_to_ptr.vmem [resolvable:$true] %s907_s29  ;;  %s910_s5 = int_to_ptr.hbm [resolvable:$true] %s909_s5 }
  0x11   :  { %410 = vmatpush.msra.mxu3 %v239_v1  ;;  %v233_v4 = vld [vmem:[#allocation5 + $0x4e8] sm:$0xff]  ;;  %v238_v6 = vld [vmem:[#allocation5 + $0x510] sm:$0xff]  ;;  %v155_v7 = vld [vmem:[#allocation5 + $0x278] sm:$0xff] }
  0x12   :  { %v227_v8 = vld [vmem:[#allocation5 + $0x4b8] sm:$0xff]  ;;  %366 = vmatpush.msra.mxu2 %v161_v3  ;;  %v154_v9 = vld [vmem:[#allocation5 + $0x270] sm:$0xff]  ;;  %v232_v10 = vld [vmem:[#allocation5 + $0x4e0] sm:$0xff]  ;;  %284 = vmatpush.msra.mxu0 %v160_v5 }
  0x13   :  { %411 = vmatpush.msra.mxu3 %v233_v4  ;;  %328 = vmatpush.msra.mxu1 %v238_v6  ;;  %v149_v11 = vld [vmem:[#allocation5 + $0x248] sm:$0xff]  ;;  %v148_v13 = vld [vmem:[#allocation5 + $0x240] sm:$0xff]  ;;  %v226_v14 = vld [vmem:[#allocation5 + $0x4b0] sm:$0xff] }
  0x14   :  { %v221_v12 = vld [vmem:[#allocation5 + $0x488] sm:$0xff]  ;;  %367 = vmatpush.msra.mxu2 %v155_v7  ;;  %285 = vmatpush.msra.mxu0 %v154_v9  ;;  %v143_v15 = vld [vmem:[#allocation5 + $0x218] sm:$0xff]  ;;  %v142_v17 = vld [vmem:[#allocation5 + $0x210] sm:$0xff] }
  0x15   :  { %412 = vmatpush.msra.mxu3 %v227_v8  ;;  %329 = vmatpush.msra.mxu1 %v232_v10  ;;  %v215_v16 = vld [vmem:[#allocation5 + $0x458] sm:$0xff]  ;;  %v220_v18 = vld [vmem:[#allocation5 + $0x480] sm:$0xff]  ;;  %v137_v19 = vld [vmem:[#allocation5 + $0x1e8] sm:$0xff] }
  0x16   :  { %368 = vmatpush.msra.mxu2 %v149_v11  ;;  %286 = vmatpush.msra.mxu0 %v148_v13  ;;  %v209_v20 = vld [vmem:[#allocation5 + $0x428] sm:$0xff]  ;;  %v136_v21 = vld [vmem:[#allocation5 + $0x1e0] sm:$0xff]  ;;  %v214_v22 = vld [vmem:[#allocation5 + $0x450] sm:$0xff] }
  0x17   :  { %413 = vmatpush.msra.mxu3 %v221_v12  ;;  %330 = vmatpush.msra.mxu1 %v226_v14  ;;  %v131_v23 = vld [vmem:[#allocation5 + $0x1b8] sm:$0xff]  ;;  %v130_v25 = vld [vmem:[#allocation5 + $0x1b0] sm:$0xff]  ;;  %v208_v26 = vld [vmem:[#allocation5 + $0x420] sm:$0xff] }
  0x18   :  { %369 = vmatpush.msra.mxu2 %v143_v15  ;;  %287 = vmatpush.msra.mxu0 %v142_v17  ;;  %v203_v24 = vld [vmem:[#allocation5 + $0x3f8] sm:$0xff]  ;;  %v125_v27 = vld [vmem:[#allocation5 + $0x188] sm:$0xff]  ;;  %v124_v29 = vld [vmem:[#allocation5 + $0x180] sm:$0xff] }
  0x19   :  { %414 = vmatpush.msra.mxu3 %v215_v16  ;;  %331 = vmatpush.msra.mxu1 %v220_v18  ;;  %v197_v28 = vld [vmem:[#allocation5 + $0x3c8] sm:$0xff]  ;;  %v202_v30 = vld [vmem:[#allocation5 + $0x3f0] sm:$0xff]  ;;  %v119_v31 = vld [vmem:[#allocation5 + $0x158] sm:$0xff] }
  0x1a   :  { %370 = vmatpush.msra.mxu2 %v137_v19  ;;  %288 = vmatpush.msra.mxu0 %v136_v21  ;;  %v191_v32 = vld [vmem:[#allocation5 + $0x398] sm:$0xff]  ;;  %v118_v33 = vld [vmem:[#allocation5 + $0x150] sm:$0xff]  ;;  %v196_v34 = vld [vmem:[#allocation5 + $0x3c0] sm:$0xff] }
  0x1b   :  { %415 = vmatpush.msra.mxu3 %v209_v20  ;;  %332 = vmatpush.msra.mxu1 %v214_v22  ;;  %v113_v35 = vld [vmem:[#allocation5 + $0x128] sm:$0xff]  ;;  %v112_v37 = vld [vmem:[#allocation5 + $0x120] sm:$0xff]  ;;  %v190_v38 = vld [vmem:[#allocation5 + $0x390] sm:$0xff] }
  0x1c   :  { %371 = vmatpush.msra.mxu2 %v131_v23  ;;  %289 = vmatpush.msra.mxu0 %v130_v25  ;;  %v185_v36 = vld [vmem:[#allocation5 + $0x368] sm:$0xff]  ;;  %v107_v39 = vld [vmem:[#allocation5 + $0xf8] sm:$0xff]  ;;  %v106_v41 = vld [vmem:[#allocation5 + $0xf0] sm:$0xff] }
  0x1d   :  { %416 = vmatpush.msra.mxu3 %v203_v24  ;;  %333 = vmatpush.msra.mxu1 %v208_v26  ;;  %v179_v40 = vld [vmem:[#allocation5 + $0x338] sm:$0xff]  ;;  %v184_v42 = vld [vmem:[#allocation5 + $0x360] sm:$0xff]  ;;  %v101_v43 = vld [vmem:[#allocation5 + $0xc8] sm:$0xff] }
  0x1e   :  { %372 = vmatpush.msra.mxu2 %v125_v27  ;;  %290 = vmatpush.msra.mxu0 %v124_v29  ;;  %v173_v44 = vld [vmem:[#allocation5 + $0x308] sm:$0xff]  ;;  %v100_v46 = vld [vmem:[#allocation5 + $0xc0] sm:$0xff]  ;;  %v178_v47 = vld [vmem:[#allocation5 + $0x330] sm:$0xff] }
  0x1f   :  { %417 = vmatpush.msra.mxu3 %v197_v28  ;;  %334 = vmatpush.msra.mxu1 %v202_v30  ;;  %v1153_v45 = vld [vmem:[#allocation2 + $0x8] sm:$0xff]  ;;  %v95_v48 = vld [vmem:[#allocation5 + $0x98] sm:$0xff]  ;;  %v94_v49 = vld [vmem:[#allocation5 + $0x90] sm:$0xff] }
  0x20   :  { %373 = vmatpush.msra.mxu2 %v119_v31  ;;  %291 = vmatpush.msra.mxu0 %v118_v33  ;;  %v240_v50 = vld [vmem:[#allocation5 + $0x520] sm:$0xff]  ;;  %v89_v52 = vld [vmem:[#allocation5 + $0x68] sm:$0xff]  ;;  %v83_v54 = vld [vmem:[#allocation5 + $0x38] sm:$0xff] }
  0x21   :  { %418 = vmatpush.msra.mxu3 %v191_v32  ;;  %335 = vmatpush.msra.mxu1 %v196_v34  ;;  %v172_v51 = vld [vmem:[#allocation5 + $0x300] sm:$0xff]  ;;  %v82_v56 = vld [vmem:[#allocation5 + $0x30] sm:$0xff]  ;;  %v77_v58 = vld [vmem:[#allocation5 + $0x8] sm:$0xff] }
  0x22   :  { %374 = vmatpush.msra.mxu2 %v113_v35  ;;  %292 = vmatpush.msra.mxu0 %v112_v37  ;;  %v88_v53 = vld [vmem:[#allocation5 + $0x60] sm:$0xff]  ;;  %v234_v57 = vld [vmem:[#allocation5 + $0x4f0] sm:$0xff]  ;;  %v1161_v61 = vld [vmem:[#allocation2 + $0x18] sm:$0xff] }
  0x23   :  { %419 = vmatpush.msra.mxu3 %v185_v36  ;;  %336 = vmatpush.msra.mxu1 %v190_v38  ;;  %v168_v55 = vld [vmem:[#allocation5 + $0x2e0] sm:$0xff]  ;;  %v162_v59 = vld [vmem:[#allocation5 + $0x2b0] sm:$0xff]  ;;  %v241_v62 = vld [vmem:[#allocation5 + $0x528] sm:$0xff] }
  0x24   :  { %375 = vmatpush.msra.mxu2 %v107_v39  ;;  %293 = vmatpush.msra.mxu0 %v106_v41  ;;  %v1159_v60 = vld [vmem:[#allocation2] sm:$0xff]  ;;  %v169_v1 = vld [vmem:[#allocation5 + $0x2e8] sm:$0xff]  ;;  %v235_v2 = vld [vmem:[#allocation5 + $0x4f8] sm:$0xff] }
  0x25   :  { %420 = vmatpush.msra.mxu3 %v179_v40  ;;  %337 = vmatpush.msra.mxu1 %v184_v42  ;;  %v76_v63 = vld [vmem:[#allocation5] sm:$0xff]  ;;  %v222_v3 = vld [vmem:[#allocation5 + $0x490] sm:$0xff]  ;;  %v163_v4 = vld [vmem:[#allocation5 + $0x2b8] sm:$0xff] }
  0x26   :  { %376 = vmatpush.msra.mxu2 %v101_v43  ;;  %294 = vmatpush.msra.mxu0 %v100_v46  ;;  %v228_v0 = vld [vmem:[#allocation5 + $0x4c0] sm:$0xff]  ;;  %v229_v5 = vld [vmem:[#allocation5 + $0x4c8] sm:$0xff]  ;;  %v223_v9 = vld [vmem:[#allocation5 + $0x498] sm:$0xff] }
  0x27   :  { %421 = vmatpush.msra.mxu3 %v173_v44  ;;  %338 = vmatpush.msra.mxu1 %v178_v47  ;;  %v156_v6 = vld [vmem:[#allocation5 + $0x280] sm:$0xff]  ;;  %v157_v8 = vld [vmem:[#allocation5 + $0x288] sm:$0xff]  ;;  %v1169_v10 = vld [vmem:[#allocation2 + $0x10] sm:$0xff] }
  0x28   :  { %931 = vmatmul.msk.f32.vlgmr.msra.gmra.mxu3 %vm258_vm0, %v1153_v45  ;;  %377 = vmatpush.msra.mxu2 %v95_v48  ;;  %v216_v7 = vld [vmem:[#allocation5 + $0x460] sm:$0xff]  ;;  %v1171_v11 = vld [vmem:[#allocation2 + $0x28] sm:$0xff]  ;;  %v150_v12 = vld [vmem:[#allocation5 + $0x250] sm:$0xff] }
  0x29   :  { %295 = vmatpush.msra.mxu0 %v94_v49  ;;  %492 = vmatpush.msrb.mxu3 %v240_v50  ;;  %v151_v13 = vld [vmem:[#allocation5 + $0x258] sm:$0xff]  ;;  %v217_v14 = vld [vmem:[#allocation5 + $0x468] sm:$0xff]  ;;  %v144_v15 = vld [vmem:[#allocation5 + $0x220] sm:$0xff] }
  0x2a   :  { %339 = vmatpush.msra.mxu1 %v172_v51  ;;  %378 = vmatpush.msra.mxu2 %v89_v52  ;;  %v145_v16 = vld [vmem:[#allocation5 + $0x228] sm:$0xff]  ;;  %v210_v17 = vld [vmem:[#allocation5 + $0x430] sm:$0xff]  ;;  %v139_v19 = vld [vmem:[#allocation5 + $0x1f8] sm:$0xff] }
  0x2b   :  { %923 = vmatmul.msk.f32.vlgmr.msra.gmra.mxu1 %vm258_vm0, %v1153_v45  ;;  %296 = vmatpush.msra.mxu0 %v88_v53  ;;  %v138_v18 = vld [vmem:[#allocation5 + $0x1f0] sm:$0xff]  ;;  %v211_v20 = vld [vmem:[#allocation5 + $0x438] sm:$0xff]  ;;  %v204_v21 = vld [vmem:[#allocation5 + $0x400] sm:$0xff] }
  0x2c   :  { %379 = vmatpush.msra.mxu2 %v83_v54  ;;  %447 = vmatpush.msrb.mxu1 %v168_v55  ;;  %v132_v22 = vld [vmem:[#allocation5 + $0x1c0] sm:$0xff]  ;;  %v133_v23 = vld [vmem:[#allocation5 + $0x1c8] sm:$0xff]  ;;  %v1181_v25 = vld [vmem:[#allocation2 + $0x38] sm:$0xff] }
  0x2d   :  { %297 = vmatpush.msra.mxu0 %v82_v56  ;;  %493 = vmatpush.msrb.mxu3 %v234_v57  ;;  %v1179_v24 = vld [vmem:[#allocation2 + $0x20] sm:$0xff]  ;;  %v126_v26 = vld [vmem:[#allocation5 + $0x190] sm:$0xff]  ;;  %v127_v27 = vld [vmem:[#allocation5 + $0x198] sm:$0xff] }
  0x2e   :  { %380 = vmatpush.msra.mxu2 %v77_v58  ;;  %448 = vmatpush.msrb.mxu1 %v162_v59  ;;  %v205_v28 = vld [vmem:[#allocation5 + $0x408] sm:$0xff]  ;;  %v120_v29 = vld [vmem:[#allocation5 + $0x160] sm:$0xff]  ;;  %v198_v31 = vld [vmem:[#allocation5 + $0x3d0] sm:$0xff] }
  0x2f   :  { %381 = vmatmul.f32.vlgmr.msra.gmra.mxu2 %v1159_v60  ;;  %298 = vmatpush.msra.mxu0 %v76_v63  ;;  %v121_v30 = vld [vmem:[#allocation5 + $0x168] sm:$0xff]  ;;  %v199_v32 = vld [vmem:[#allocation5 + $0x3d8] sm:$0xff]  ;;  %v114_v33 = vld [vmem:[#allocation5 + $0x130] sm:$0xff] }
  0x30   :  { %932 = vmatmul.msk.f32.gmra.mxu3 %vm258_vm0, %v1161_v61  ;;  %574 = vmatpush.msrb.mxu2 %v241_v62  ;;  %v115_v34 = vld [vmem:[#allocation5 + $0x138] sm:$0xff]  ;;  %v192_v35 = vld [vmem:[#allocation5 + $0x3a0] sm:$0xff]  ;;  %v193_v36 = vld [vmem:[#allocation5 + $0x3a8] sm:$0xff] }
  0x31   :  { %299 = vmatmul.f32.vlgmr.msra.gmra.mxu0 %v1159_v60  ;;  %494 = vmatpush.msrb.mxu3 %v228_v0  ;;  %v108_v37 = vld [vmem:[#allocation5 + $0x100] sm:$0xff]  ;;  %v1189_v38 = vld [vmem:[#allocation2 + $0x30] sm:$0xff]  ;;  %v1191_v39 = vld [vmem:[#allocation2 + $0x48] sm:$0xff] }
  0x32   :  { %529 = vmatpush.msrb.mxu0 %v169_v1  ;;  %575 = vmatpush.msrb.mxu2 %v235_v2  ;;  %v109_v40 = vld [vmem:[#allocation5 + $0x108] sm:$0xff]  ;;  %v102_v41 = vld [vmem:[#allocation5 + $0xd0] sm:$0xff]  ;;  %v103_v43 = vld [vmem:[#allocation5 + $0xd8] sm:$0xff] }
  0x33   :  { %924 = vmatmul.msk.f32.gmra.mxu1 %vm258_vm0, %v1161_v61  ;;  %495 = vmatpush.msrb.mxu3 %v222_v3  ;;  %v186_v42 = vld [vmem:[#allocation5 + $0x370] sm:$0xff]  ;;  %v187_v44 = vld [vmem:[#allocation5 + $0x378] sm:$0xff]  ;;  %v180_v46 = vld [vmem:[#allocation5 + $0x340] sm:$0xff] }
  0x34   :  { %530 = vmatpush.msrb.mxu0 %v163_v4  ;;  %576 = vmatpush.msrb.mxu2 %v229_v5  ;;  %v96_v47 = vld [vmem:[#allocation5 + $0xa0] sm:$0xff]  ;;  %v97_v48 = vld [vmem:[#allocation5 + $0xa8] sm:$0xff]  ;;  %v174_v50 = vld [vmem:[#allocation5 + $0x310] sm:$0xff] }
  0x35   :  { %449 = vmatpush.msrb.mxu1 %v156_v6  ;;  %496 = vmatpush.msrb.mxu3 %v216_v7  ;;  %v181_v49 = vld [vmem:[#allocation5 + $0x348] sm:$0xff]  ;;  %v90_v51 = vld [vmem:[#allocation5 + $0x70] sm:$0xff]  ;;  %v91_v52 = vld [vmem:[#allocation5 + $0x78] sm:$0xff] }
  0x36   :  { %531 = vmatpush.msrb.mxu0 %v157_v8  ;;  %577 = vmatpush.msrb.mxu2 %v223_v9  ;;  %v1199_v53 = vld [vmem:[#allocation2 + $0x40] sm:$0xff]  ;;  %v1201_v54 = vld [vmem:[#allocation2 + $0x58] sm:$0xff]  ;;  %v78_v57 = vld [vmem:[#allocation5 + $0x10] sm:$0xff] }
  0x37   :  { %384 = vmatmul.f32.gmra.mxu2 %v1169_v10  ;;  %450 = vmatpush.msrb.mxu1 %v150_v12  ;;  %v84_v55 = vld [vmem:[#allocation5 + $0x40] sm:$0xff]  ;;  %v175_v56 = vld [vmem:[#allocation5 + $0x318] sm:$0xff]  ;;  %v85_v58 = vld [vmem:[#allocation5 + $0x48] sm:$0xff] }
  0x38   :  { %933 = vmatmul.msk.f32.gmra.mxu3 %vm258_vm0, %v1171_v11  ;;  %532 = vmatpush.msrb.mxu0 %v151_v13  ;;  %v242_v59 = vld [vmem:[#allocation5 + $0x530] sm:$0xff]  ;;  %v243_v62 = vld [vmem:[#allocation5 + $0x538] sm:$0xff]  ;;  %v236_v2 = vld [vmem:[#allocation5 + $0x500] sm:$0xff] }
  0x39   :  { %302 = vmatmul.f32.gmra.mxu0 %v1169_v10  ;;  %578 = vmatpush.msrb.mxu2 %v217_v14  ;;  %v79_v63 = vld [vmem:[#allocation5 + $0x18] sm:$0xff]  ;;  %v170_v0 = vld [vmem:[#allocation5 + $0x2f0] sm:$0xff]  ;;  %v1211_v4 = vld [vmem:[#allocation2 + $0x68] sm:$0xff] }
  0x3a   :  { %451 = vmatpush.msrb.mxu1 %v144_v15  ;;  %533 = vmatpush.msrb.mxu0 %v145_v16  ;;  %v171_v1 = vld [vmem:[#allocation5 + $0x2f8] sm:$0xff]  ;;  %v1209_v3 = vld [vmem:[#allocation2 + $0x50] sm:$0xff]  ;;  %v237_v5 = vld [vmem:[#allocation5 + $0x508] sm:$0xff] }
  0x3b   :  { %925 = vmatmul.msk.f32.gmra.mxu1 %vm258_vm0, %v1171_v11  ;;  %497 = vmatpush.msrb.mxu3 %v210_v17  ;;  %v164_v6 = vld [vmem:[#allocation5 + $0x2c0] sm:$0xff]  ;;  %v165_v7 = vld [vmem:[#allocation5 + $0x2c8] sm:$0xff]  ;;  %v230_v8 = vld [vmem:[#allocation5 + $0x4d0] sm:$0xff] }
  0x3c   :  { %452 = vmatpush.msrb.mxu1 %v138_v18  ;;  %534 = vmatpush.msrb.mxu0 %v139_v19  ;;  %v231_v9 = vld [vmem:[#allocation5 + $0x4d8] sm:$0xff]  ;;  %v158_v12 = vld [vmem:[#allocation5 + $0x290] sm:$0xff]  ;;  %v1219_v14 = vld [vmem:[#allocation2 + $0x60] sm:$0xff] }
  0x3d   :  { %579 = vmatpush.msrb.mxu2 %v211_v20  ;;  %498 = vmatpush.msrb.mxu3 %v204_v21  ;;  %v159_v13 = vld [vmem:[#allocation5 + $0x298] sm:$0xff]  ;;  %v152_v16 = vld [vmem:[#allocation5 + $0x260] sm:$0xff]  ;;  %v153_v18 = vld [vmem:[#allocation5 + $0x268] sm:$0xff] }
  0x3e   :  { %453 = vmatpush.msrb.mxu1 %v132_v22  ;;  %535 = vmatpush.msrb.mxu0 %v133_v23  ;;  %v1221_v15 = vld [vmem:[#allocation2 + $0x78] sm:$0xff]  ;;  %v224_v17 = vld [vmem:[#allocation5 + $0x4a0] sm:$0xff]  ;;  %v225_v19 = vld [vmem:[#allocation5 + $0x4a8] sm:$0xff] }
  0x3f   :  { %387 = vmatmul.f32.gmra.mxu2 %v1179_v24  ;;  %499 = vmatpush.msrb.mxu3 %v198_v31  ;;  %v146_v20 = vld [vmem:[#allocation5 + $0x230] sm:$0xff]  ;;  %v147_v21 = vld [vmem:[#allocation5 + $0x238] sm:$0xff] }
  0x40   :  { %934 = vmatmul.msk.f32.gmra.mxu3 %vm258_vm0, %v1181_v25  ;;  %454 = vmatpush.msrb.mxu1 %v126_v26  ;;  %v218_v22 = vld [vmem:[#allocation5 + $0x470] sm:$0xff]  ;;  %v219_v26 = vld [vmem:[#allocation5 + $0x478] sm:$0xff] }
  0x41   :  { %536 = vmatpush.msrb.mxu0 %v127_v27  ;;  %580 = vmatpush.msrb.mxu2 %v205_v28  ;;  %v1229_v23 = vld [vmem:[#allocation2 + $0x70] sm:$0xff]  ;;  %v140_v27 = vld [vmem:[#allocation5 + $0x200] sm:$0xff]  ;;  %v141_v28 = vld [vmem:[#allocation5 + $0x208] sm:$0xff] }
  0x42   :  { %305 = vmatmul.f32.gmra.mxu0 %v1179_v24  ;;  %455 = vmatpush.msrb.mxu1 %v120_v29  ;;  %v212_v29 = vld [vmem:[#allocation5 + $0x440] sm:$0xff]  ;;  %v134_v31 = vld [vmem:[#allocation5 + $0x1d0] sm:$0xff] }
  0x43   :  { %537 = vmatpush.msrb.mxu0 %v121_v30  ;;  %926 = vmatmul.msk.f32.gmra.mxu1 %vm258_vm0, %v1181_v25  ;;  %v213_v30 = vld [vmem:[#allocation5 + $0x448] sm:$0xff] }
  0x44   :  { %581 = vmatpush.msrb.mxu2 %v199_v32  ;;  %456 = vmatpush.msrb.mxu1 %v114_v33  ;;  %v135_v32 = vld [vmem:[#allocation5 + $0x1d8] sm:$0xff]  ;;  %v128_v33 = vld [vmem:[#allocation5 + $0x1a0] sm:$0xff] }
  0x45   :  { %538 = vmatpush.msrb.mxu0 %v115_v34  ;;  %500 = vmatpush.msrb.mxu3 %v192_v35  ;;  %v206_v34 = vld [vmem:[#allocation5 + $0x410] sm:$0xff]  ;;  %v129_v35 = vld [vmem:[#allocation5 + $0x1a8] sm:$0xff] }
  0x46   :  { %582 = vmatpush.msrb.mxu2 %v193_v36  ;;  %457 = vmatpush.msrb.mxu1 %v108_v37  ;;  %v207_v36 = vld [vmem:[#allocation5 + $0x418] sm:$0xff]  ;;  %v122_v37 = vld [vmem:[#allocation5 + $0x170] sm:$0xff] }
  0x47   :  { %390 = vmatmul.f32.gmra.mxu2 %v1189_v38  ;;  %539 = vmatpush.msrb.mxu0 %v109_v40  ;;  %v123_v40 = vld [vmem:[#allocation5 + $0x178] sm:$0xff] }
  0x48   :  { %935 = vmatmul.msk.f32.gmra.mxu3 %vm258_vm0, %v1191_v39  ;;  %458 = vmatpush.msrb.mxu1 %v102_v41  ;;  %v200_v41 = vld [vmem:[#allocation5 + $0x3e0] sm:$0xff] }
  0x49   :  { %501 = vmatpush.msrb.mxu3 %v186_v42  ;;  %540 = vmatpush.msrb.mxu0 %v103_v43  ;;  %v201_v42 = vld [vmem:[#allocation5 + $0x3e8] sm:$0xff]  ;;  %v116_v43 = vld [vmem:[#allocation5 + $0x140] sm:$0xff] }
  0x4a   :  { %308 = vmatmul.f32.gmra.mxu0 %v1189_v38  ;;  %583 = vmatpush.msrb.mxu2 %v187_v44  ;;  %v117_v44 = vld [vmem:[#allocation5 + $0x148] sm:$0xff] }
  0x4b   :  { %927 = vmatmul.msk.f32.gmra.mxu1 %vm258_vm0, %v1191_v39  ;;  %502 = vmatpush.msrb.mxu3 %v180_v46  ;;  %v194_v46 = vld [vmem:[#allocation5 + $0x3b0] sm:$0xff] }
  0x4c   :  { %459 = vmatpush.msrb.mxu1 %v96_v47  ;;  %541 = vmatpush.msrb.mxu0 %v97_v48  ;;  %v195_v47 = vld [vmem:[#allocation5 + $0x3b8] sm:$0xff]  ;;  %v110_v48 = vld [vmem:[#allocation5 + $0x110] sm:$0xff] }
  0x4d   :  { %584 = vmatpush.msrb.mxu2 %v181_v49  ;;  %503 = vmatpush.msrb.mxu3 %v174_v50  ;;  %v111_v49 = vld [vmem:[#allocation5 + $0x118] sm:$0xff]  ;;  %v104_v50 = vld [vmem:[#allocation5 + $0xe0] sm:$0xff] }
  0x4e   :  { %460 = vmatpush.msrb.mxu1 %v90_v51  ;;  %542 = vmatpush.msrb.mxu0 %v91_v52  ;;  %v188_v51 = vld [vmem:[#allocation5 + $0x380] sm:$0xff]  ;;  %v105_v52 = vld [vmem:[#allocation5 + $0xe8] sm:$0xff] }
  0x4f   :  { %393 = vmatmul.f32.gmra.mxu2 %v1199_v53  ;;  %656 = vmatpush.msra.mxu3 %v242_v59  ;;  %v183_v59 = vld [vmem:[#allocation5 + $0x358] sm:$0xff] }
  0x50   :  { %936 = vmatmul.msk.f32.gmra.mxu3 %vm258_vm0, %v1201_v54  ;;  %461 = vmatpush.msrb.mxu1 %v84_v55  ;;  %v189_v55 = vld [vmem:[#allocation5 + $0x388] sm:$0xff] }
  0x51   :  { %585 = vmatpush.msrb.mxu2 %v175_v56  ;;  %543 = vmatpush.msrb.mxu0 %v85_v58  ;;  %v98_v56 = vld [vmem:[#allocation5 + $0xb0] sm:$0xff] }
  0x52   :  { %311 = vmatmul.f32.gmra.mxu0 %v1199_v53  ;;  %462 = vmatpush.msrb.mxu1 %v78_v57  ;;  %v99_v57 = vld [vmem:[#allocation5 + $0xb8] sm:$0xff]  ;;  %v182_v58 = vld [vmem:[#allocation5 + $0x350] sm:$0xff] }
  0x53   :  { %928 = vmatmul.msk.f32.gmra.mxu1 %vm258_vm0, %v1201_v54  ;;  %738 = vmatpush.msra.mxu2 %v243_v62  ;;  %v92_v62 = vld [vmem:[#allocation5 + $0x80] sm:$0xff] }
  0x54   :  { %544 = vmatpush.msrb.mxu0 %v79_v63  ;;  %611 = vmatpush.msra.mxu1 %v170_v0  ;;  %v176_v63 = vld [vmem:[#allocation5 + $0x320] sm:$0xff]  ;;  %v93_v0 = vld [vmem:[#allocation5 + $0x88] sm:$0xff] }
  0x55   :  { %657 = vmatpush.msra.mxu3 %v236_v2  ;;  %739 = vmatpush.msra.mxu2 %v237_v5  ;;  %v80_v2 = vld [vmem:[#allocation5 + $0x20] sm:$0xff]  ;;  %v177_v5 = vld [vmem:[#allocation5 + $0x328] sm:$0xff] }
  0x56   :  { %693 = vmatpush.msra.mxu0 %v171_v1  ;;  %612 = vmatpush.msra.mxu1 %v164_v6  ;;  %v86_v1 = vld [vmem:[#allocation5 + $0x50] sm:$0xff]  ;;  %v87_v6 = vld [vmem:[#allocation5 + $0x58] sm:$0xff] }
  0x57   :  { %396 = vmatmul.f32.gmra.mxu2 %v1209_v3  ;;  %658 = vmatpush.msra.mxu3 %v230_v8 }
  0x58   :  { %937 = vmatmul.msk.f32.gmra.mxu3 %vm258_vm0, %v1211_v4  ;;  %694 = vmatpush.msra.mxu0 %v165_v7  ;;  %v81_v7 = vld [vmem:[#allocation5 + $0x28] sm:$0xff] }
  0x59   :  { %740 = vmatpush.msra.mxu2 %v231_v9  ;;  %613 = vmatpush.msra.mxu1 %v158_v12  ;;  %v1282_v9 = vld [vmem:[#allocation7] sm:$0x3f] }
  0x5a   :  { %314 = vmatmul.f32.gmra.mxu0 %v1209_v3  ;;  %659 = vmatpush.msra.mxu3 %v224_v17 }
  0x5b   :  { %929 = vmatmul.msk.f32.gmra.mxu1 %vm258_vm0, %v1211_v4  ;;  %695 = vmatpush.msra.mxu0 %v159_v13  ;;  %v1287_v13 = vperm.slane %v1282_v9, 0 }
  0x5c   :  { %614 = vmatpush.msra.mxu1 %v152_v16  ;;  %741 = vmatpush.msra.mxu2 %v225_v19 }
  0x5d   :  { %696 = vmatpush.msra.mxu0 %v153_v18  ;;  %660 = vmatpush.msra.mxu3 %v218_v22  ;;  %v1295_v18 = vperm.slane %v1282_v9, 1 }
  0x5e   :  { %615 = vmatpush.msra.mxu1 %v146_v20  ;;  %742 = vmatpush.msra.mxu2 %v219_v26 }
  0x5f   :  { %399 = vmatmul.f32.gmra.mxu2 %v1219_v14  ;;  %697 = vmatpush.msra.mxu0 %v147_v21 }
  0x60   :  { %938 = vmatmul.msk.f32.gmra.mxu3 %vm258_vm0, %v1221_v15  ;;  %616 = vmatpush.msra.mxu1 %v140_v27 }
  0x61   :  { %698 = vmatpush.msra.mxu0 %v141_v28  ;;  %661 = vmatpush.msra.mxu3 %v212_v29 }
  0x62   :  { %317 = vmatmul.f32.gmra.mxu0 %v1219_v14  ;;  %743 = vmatpush.msra.mxu2 %v213_v30 }
  0x63   :  { %930 = vmatmul.msk.f32.gmra.mxu1 %vm258_vm0, %v1221_v15  ;;  %699 = vmatpush.msra.mxu0 %v135_v32 }
  0x64   :  { %617 = vmatpush.msra.mxu1 %v134_v31  ;;  %662 = vmatpush.msra.mxu3 %v206_v34 }
  0x65   :  { %744 = vmatpush.msra.mxu2 %v207_v36  ;;  %700 = vmatpush.msra.mxu0 %v129_v35 }
  0x66   :  { %618 = vmatpush.msra.mxu1 %v128_v33  ;;  %663 = vmatpush.msra.mxu3 %v200_v41 }
  0x67   :  { %402 = vmatmul.f32.gmra.mxu2 %v1229_v23  ;;  %701 = vmatpush.msra.mxu0 %v123_v40 }
  0x68   :  { %939 = vmatmul.msk.f32.vlgmr.msrb.gmra.mxu3 %vm258_vm0, %v1153_v45  ;;  %619 = vmatpush.msra.mxu1 %v122_v37 }
  0x69   :  { %745 = vmatpush.msra.mxu2 %v201_v42  ;;  %702 = vmatpush.msra.mxu0 %v117_v44 }
  0x6a   :  { %320 = vmatmul.f32.gmra.mxu0 %v1229_v23  ;;  %620 = vmatpush.msra.mxu1 %v116_v43 }
  0x6b   :  { %463 = vmatmul.f32.vlgmr.msrb.gmra.mxu1 %v1159_v60  ;;  %664 = vmatpush.msra.mxu3 %v194_v46 }
  0x6c   :  { %746 = vmatpush.msra.mxu2 %v195_v47  ;;  %621 = vmatpush.msra.mxu1 %v110_v48 }
  0x6d   :  { %703 = vmatpush.msra.mxu0 %v111_v49  ;;  %665 = vmatpush.msra.mxu3 %v188_v51 }
  0x6e   :  { %622 = vmatpush.msra.mxu1 %v104_v50  ;;  %747 = vmatpush.msra.mxu2 %v189_v55 }
  0x6f   :  { %947 = vmatmul.msk.f32.vlgmr.msrb.gmra.mxu2 %vm258_vm0, %v1153_v45  ;;  %704 = vmatpush.msra.mxu0 %v105_v52 }
  0x70   :  { %940 = vmatmul.msk.f32.gmra.mxu3 %vm258_vm0, %v1161_v61  ;;  %623 = vmatpush.msra.mxu1 %v98_v56 }
  0x71   :  { %705 = vmatpush.msra.mxu0 %v99_v57  ;;  %666 = vmatpush.msra.mxu3 %v182_v58 }
  0x72   :  { %545 = vmatmul.f32.vlgmr.msrb.gmra.mxu0 %v1159_v60  ;;  %748 = vmatpush.msra.mxu2 %v183_v59 }
  0x73   :  { %466 = vmatmul.f32.gmra.mxu1 %v1169_v10  ;;  %667 = vmatpush.msra.mxu3 %v176_v63 }
  0x74   :  { %624 = vmatpush.msra.mxu1 %v92_v62  ;;  %706 = vmatpush.msra.mxu0 %v93_v0 }
  0x75   :  { %749 = vmatpush.msra.mxu2 %v177_v5 }
  0x76   :  { %625 = vmatpush.msra.mxu1 %v86_v1  ;;  %707 = vmatpush.msra.mxu0 %v87_v6 }
  0x77   :  { %948 = vmatmul.msk.f32.gmra.mxu2 %vm258_vm0, %v1161_v61 }
  0x78   :  { %941 = vmatmul.msk.f32.gmra.mxu3 %vm258_vm0, %v1171_v11  ;;  %626 = vmatpush.msra.mxu1 %v80_v2 }
  0x79   :  { %708 = vmatpush.msra.mxu0 %v81_v7 }
  0x7a   :  { %548 = vmatmul.f32.gmra.mxu0 %v1169_v10 }
  0x7b   :  { %469 = vmatmul.f32.gmra.mxu1 %v1179_v24 }
  0x7f   :  { %949 = vmatmul.msk.f32.gmra.mxu2 %vm258_vm0, %v1171_v11 }
  0x80   :  { %942 = vmatmul.msk.f32.gmra.mxu3 %vm258_vm0, %v1181_v25 }
  0x82   :  { %551 = vmatmul.f32.gmra.mxu0 %v1179_v24 }
  0x83   :  { %472 = vmatmul.f32.gmra.mxu1 %v1189_v38 }
  0x87   :  { %950 = vmatmul.msk.f32.gmra.mxu2 %vm258_vm0, %v1181_v25 }
  0x88   :  { %943 = vmatmul.msk.f32.gmra.mxu3 %vm258_vm0, %v1191_v39 }
  0x8a   :  { %554 = vmatmul.f32.gmra.mxu0 %v1189_v38 }
  0x8b   :  { %475 = vmatmul.f32.gmra.mxu1 %v1199_v53 }
  0x8f   :  { %951 = vmatmul.msk.f32.gmra.mxu2 %vm258_vm0, %v1191_v39 }
  0x90   :  { %944 = vmatmul.msk.f32.gmra.mxu3 %vm258_vm0, %v1201_v54 }
  0x92   :  { %557 = vmatmul.f32.gmra.mxu0 %v1199_v53 }
  0x93   :  { %478 = vmatmul.f32.gmra.mxu1 %v1209_v3 }
  0x97   :  { %952 = vmatmul.msk.f32.gmra.mxu2 %vm258_vm0, %v1201_v54 }
  0x98   :  { %945 = vmatmul.msk.f32.gmra.mxu3 %vm258_vm0, %v1211_v4 }
  0x9a   :  { %560 = vmatmul.f32.gmra.mxu0 %v1209_v3 }
  0x9b   :  { %481 = vmatmul.f32.gmra.mxu1 %v1219_v14 }
  0x9f   :  { %953 = vmatmul.msk.f32.gmra.mxu2 %vm258_vm0, %v1211_v4 }
  0xa0   :  { %946 = vmatmul.msk.f32.gmra.mxu3 %vm258_vm0, %v1221_v15 }
  0xa2   :  { %563 = vmatmul.f32.gmra.mxu0 %v1219_v14 }
  0xa3   :  { %484 = vmatmul.f32.gmra.mxu1 %v1229_v23 }
  0xa7   :  { %954 = vmatmul.msk.f32.gmra.mxu2 %vm258_vm0, %v1221_v15 }
  0xa8   :  { %955 = vmatmul.msk.f32.vlgmr.msra.gmra.mxu3 %vm258_vm0, %v1153_v45  ;;  %v341_v8 = vpop.f32.mrf.mxu1 }
  0xaa   :  { %566 = vmatmul.f32.gmra.mxu0 %v1229_v23 }
  0xab   :  { %v423_v12 = vpop.f32.mrf.mxu3  ;;  %627 = vmatmul.f32.vlgmr.msra.gmra.mxu1 %v1159_v60 }
  0xae   :  { %v300_v16 = vpop.f32.mrf.mxu0 }
  0xaf   :  { %v301_v17 = vadd.f32 %v300_v16, %v1287_v13  ;;  %963 = vmatmul.msk.f32.vlgmr.msra.gmra.mxu2 %vm258_vm0, %v1153_v45 }
  0xb0   :  { %956 = vmatmul.msk.f32.gmra.mxu3 %vm258_vm0, %v1161_v61  ;;  %v344_v19 = vpop.f32.mrf.mxu1 }
  0xb1   :  { %v1297_v20 = vadd.f32 %v341_v8, %v301_v17 }
  0xb2   :  { %709 = vmatmul.f32.vlgmr.msra.gmra.mxu0 %v1159_v60  ;;  %v382_v21 = vpop.f32.mrf.mxu2 }
  0xb3   :  { %v426_v22 = vpop.f32.mrf.mxu3  ;;  %v383_v26 = vadd.f32 %v382_v21, %v1295_v18  ;;  %630 = vmatmul.f32.gmra.mxu1 %v1169_v10 }
  0xb5   :  { %v1302_v27 = vadd.f32 %v423_v12, %v383_v26 }
  0xb6   :  { %v303_v28 = vpop.f32.mrf.mxu0 }
  0xb7   :  { %v304_v29 = vadd.f32 %v303_v28, %v1287_v13  ;;  %964 = vmatmul.msk.f32.gmra.mxu2 %vm258_vm0, %v1161_v61 }
  0xb8   :  { %957 = vmatmul.msk.f32.gmra.mxu3 %vm258_vm0, %v1171_v11  ;;  %v347_v45 = vpop.f32.mrf.mxu1 }
  0xb9   :  { %v1309_v30 = vadd.f32 %v344_v19, %v304_v29 }
  0xba   :  { %712 = vmatmul.f32.gmra.mxu0 %v1169_v10  ;;  %v385_v60 = vpop.f32.mrf.mxu2 }
  0xbb   :  { %v429_v31 = vpop.f32.mrf.mxu3  ;;  %v386_v32 = vadd.f32 %v385_v60, %v1295_v18  ;;  %633 = vmatmul.f32.gmra.mxu1 %v1179_v24 }
  0xbd   :  { %v1314_v33 = vadd.f32 %v426_v22, %v386_v32 }
  0xbf   :  { %v306_v34 = vpop.f32.mrf.mxu0  ;;  %965 = vmatmul.msk.f32.gmra.mxu2 %vm258_vm0, %v1171_v11 }
  0xc0   :  { %v307_v35 = vadd.f32 %v306_v34, %v1287_v13  ;;  %958 = vmatmul.msk.f32.gmra.mxu3 %vm258_vm0, %v1181_v25  ;;  %v350_v61 = vpop.f32.mrf.mxu1 }
  0xc2   :  { %v1321_v36 = vadd.f32 %v347_v45, %v307_v35  ;;  %715 = vmatmul.f32.gmra.mxu0 %v1179_v24  ;;  %v388_v10 = vpop.f32.mrf.mxu2 }
  0xc3   :  { %v432_v37 = vpop.f32.mrf.mxu3  ;;  %v389_v40 = vadd.f32 %v388_v10, %v1295_v18  ;;  %636 = vmatmul.f32.gmra.mxu1 %v1189_v38 }
  0xc5   :  { %v1326_v41 = vadd.f32 %v429_v31, %v389_v40 }
  0xc7   :  { %v309_v42 = vpop.f32.mrf.mxu0  ;;  %966 = vmatmul.msk.f32.gmra.mxu2 %vm258_vm0, %v1181_v25 }
  0xc8   :  { %v310_v43 = vadd.f32 %v309_v42, %v1287_v13  ;;  %959 = vmatmul.msk.f32.gmra.mxu3 %vm258_vm0, %v1191_v39  ;;  %v353_v11 = vpop.f32.mrf.mxu1 }
  0xca   :  { %v1333_v44 = vadd.f32 %v350_v61, %v310_v43  ;;  %718 = vmatmul.f32.gmra.mxu0 %v1189_v38  ;;  %v391_v24 = vpop.f32.mrf.mxu2 }
  0xcb   :  { %v435_v46 = vpop.f32.mrf.mxu3  ;;  %v392_v47 = vadd.f32 %v391_v24, %v1295_v18  ;;  %639 = vmatmul.f32.gmra.mxu1 %v1199_v53  ;;  %v1404_v24 = vperm.slane %v1282_v9, 2 }
  0xcd   :  { %v1338_v48 = vadd.f32 %v432_v37, %v392_v47 }
  0xcf   :  { %v312_v49 = vpop.f32.mrf.mxu0  ;;  %967 = vmatmul.msk.f32.gmra.mxu2 %vm258_vm0, %v1191_v39 }
  0xd0   :  { %v313_v50 = vadd.f32 %v312_v49, %v1287_v13  ;;  %960 = vmatmul.msk.f32.gmra.mxu3 %vm258_vm0, %v1201_v54  ;;  %v356_v25 = vpop.f32.mrf.mxu1 }
  0xd2   :  { %v1345_v51 = vadd.f32 %v353_v11, %v313_v50  ;;  %721 = vmatmul.f32.gmra.mxu0 %v1199_v53  ;;  %v394_v38 = vpop.f32.mrf.mxu2 }
  0xd3   :  { %v438_v52 = vpop.f32.mrf.mxu3  ;;  %v395_v55 = vadd.f32 %v394_v38, %v1295_v18  ;;  %642 = vmatmul.f32.gmra.mxu1 %v1209_v3  ;;  %v1416_v38 = vperm.slane %v1282_v9, 3 }
  0xd5   :  { %v1350_v56 = vadd.f32 %v435_v46, %v395_v55 }
  0xd7   :  { %v315_v57 = vpop.f32.mrf.mxu0  ;;  %968 = vmatmul.msk.f32.gmra.mxu2 %vm258_vm0, %v1201_v54 }
  0xd8   :  { %v316_v58 = vadd.f32 %v315_v57, %v1287_v13  ;;  %961 = vmatmul.msk.f32.gmra.mxu3 %vm258_vm0, %v1211_v4  ;;  %v359_v39 = vpop.f32.mrf.mxu1 }
  0xda   :  { %v1357_v59 = vadd.f32 %v356_v25, %v316_v58  ;;  %724 = vmatmul.f32.gmra.mxu0 %v1209_v3  ;;  %v397_v53 = vpop.f32.mrf.mxu2 }
  0xdb   :  { %v441_v62 = vpop.f32.mrf.mxu3  ;;  %v398_v63 = vadd.f32 %v397_v53, %v1295_v18  ;;  %645 = vmatmul.f32.gmra.mxu1 %v1219_v14 }
  0xdd   :  { %v1362_v0 = vadd.f32 %v438_v52, %v398_v63 }
  0xdf   :  { %v318_v1 = vpop.f32.mrf.mxu0  ;;  %969 = vmatmul.msk.f32.gmra.mxu2 %vm258_vm0, %v1211_v4 }
  0xe0   :  { %v319_v2 = vadd.f32 %v318_v1, %v1287_v13  ;;  %962 = vmatmul.msk.f32.gmra.mxu3 %vm258_vm0, %v1221_v15  ;;  %v362_v54 = vpop.f32.mrf.mxu1 }
  0xe2   :  { %v1369_v5 = vadd.f32 %v359_v39, %v319_v2  ;;  %727 = vmatmul.f32.gmra.mxu0 %v1219_v14  ;;  %v400_v3 = vpop.f32.mrf.mxu2  ;;  %v1429_v2 = vperm.slane %v1282_v9, 4 }
  0xe3   :  { %v444_v6 = vpop.f32.mrf.mxu3  ;;  %v401_v7 = vadd.f32 %v400_v3, %v1295_v18  ;;  %648 = vmatmul.f32.gmra.mxu1 %v1229_v23 }
  0xe5   :  { %v1374_v8 = vadd.f32 %v441_v62, %v401_v7 }
  0xe7   :  { %v321_v12 = vpop.f32.mrf.mxu0  ;;  %970 = vmatmul.msk.f32.gmra.mxu2 %vm258_vm0, %v1221_v15 }
  0xe8   :  { %v322_v16 = vadd.f32 %v321_v12, %v1287_v13  ;;  %v464_v4 = vpop.f32.mrf.mxu1 }
  0xe9   :  { %v465_v49 = vadd.f32 %v464_v4, %v1404_v24 }
  0xea   :  { %v1379_v17 = vadd.f32 %v362_v54, %v322_v16  ;;  %730 = vmatmul.f32.gmra.mxu0 %v1229_v23  ;;  %v403_v14 = vpop.f32.mrf.mxu2 }
  0xeb   :  { %v505_v19 = vpop.f32.mrf.mxu3  ;;  %v404_v21 = vadd.f32 %v403_v14, %v1295_v18 }
  0xec   :  { %v506_v52 = vadd.f32 %v505_v19, %v465_v49 }
  0xed   :  { %v1383_v22 = vadd.f32 %v444_v6, %v404_v21 }
  0xee   :  { %979 = vtanh.f32 %v506_v52 }
  0xef   :  { %v546_v26 = vpop.f32.mrf.mxu0 }
  0xf0   :  { %v467_v28 = vpop.f32.mrf.mxu1  ;;  %v547_v39 = vadd.f32 %v546_v26, %v1416_v38  ;;  %v1440_v26 = vperm.slane %v1282_v9, 5 }
  0xf1   :  { %v468_v57 = vadd.f32 %v467_v28, %v1404_v24 }
  0xf2   :  { %v587_v45 = vpop.f32.mrf.mxu2 }
  0xf3   :  { %v508_v29 = vpop.f32.mrf.mxu3  ;;  %v588_v1 = vadd.f32 %v587_v45, %v547_v39 }
  0xf4   :  { %v509_v63 = vadd.f32 %v508_v29, %v468_v57  ;;  %v980_v3 = vpop.eup %979 }
  0xf5   :  { %v791_v21 = vadd.f32 %v980_v3, %v1297_v20 }
  0xf6   :  { %981 = vtanh.f32 %v509_v63 }
  0xf7   :  { %v549_v60 = vpop.f32.mrf.mxu0  ;;  %983 = vtanh.f32 %v588_v1 }
  0xf8   :  { %v470_v13 = vpop.f32.mrf.mxu1  ;;  %v550_v16 = vadd.f32 %v549_v60, %v1416_v38 }
  0xf9   :  { %v471_v7 = vadd.f32 %v470_v13, %v1404_v24 }
  0xfa   :  { %v590_v32 = vpop.f32.mrf.mxu2 }
  0xfb   :  { %v511_v31 = vpop.f32.mrf.mxu3  ;;  %v591_v49 = vadd.f32 %v590_v32, %v550_v16 }
  0xfc   :  { %v512_v28 = vadd.f32 %v511_v31, %v471_v7  ;;  %v982_v45 = vpop.eup %981 }
  0xfd   :  { %v984_v57 = vpop.eup %983  ;;  %v793_v3 = vadd.f32 %v982_v45, %v1309_v30 }
  0xfe   :  { %985 = vtanh.f32 %v512_v28 }
  0xff   :  { %v552_v15 = vpop.f32.mrf.mxu0  ;;  %987 = vtanh.f32 %v591_v49 }
 0x100   :  { %v473_v34 = vpop.f32.mrf.mxu1  ;;  %v553_v63 = vadd.f32 %v552_v15, %v1416_v38 }
 0x101   :  { %v474_v13 = vadd.f32 %v473_v34, %v1404_v24 }
 0x102   :  { %v1385_v61 = vpop.f32.mrf.mxu2 }
 0x103   :  { %v514_v35 = vpop.f32.mrf.mxu3 }
 0x104   :  { %v515_v7 = vadd.f32 %v514_v35, %v474_v13  ;;  %v986_v28 = vpop.eup %985 }
 0x105   :  { %v988_v30 = vpop.eup %987 }
 0x106   :  { %989 = vtanh.f32 %v515_v7 }
 0x107   :  { %v1387_v23 = vpop.f32.mrf.mxu0 }
 0x108   :  { %v1389_v10 = vpop.f32.mrf.mxu1 }
 0x10a   :  { %v1393_v37 = vpop.f32.mrf.mxu2 }
 0x10b   :  { %v1391_v18 = vpop.f32.mrf.mxu3 }
 0x10f   :  { %v1395_v40 = vpop.f32.mrf.mxu0 }
 0x110   :  { %v1397_v42 = vpop.f32.mrf.mxu1 }
 0x112   :  { %v1401_v11 = vpop.f32.mrf.mxu2 }
 0x113   :  { %v1399_v43 = vpop.f32.mrf.mxu3 }
 0x117   :  { %v1406_v46 = vpop.f32.mrf.mxu0 }
 0x118   :  { %v1408_v47 = vpop.f32.mrf.mxu1 }
 0x11a   :  { %v1413_v25 = vpop.f32.mrf.mxu2 }
 0x11b   :  { %v1411_v50 = vpop.f32.mrf.mxu3 }
 0x11f   :  { %v1418_v55 = vpop.f32.mrf.mxu0 }
 0x120   :  { %v1421_v58 = vpop.f32.mrf.mxu1 }
 0x122   :  { %v1426_v62 = vpop.f32.mrf.mxu2 }
 0x123   :  { %v1424_v53 = vpop.f32.mrf.mxu3 }
 0x127   :  { %v1431_v54 = vpop.f32.mrf.mxu0 }
 0x128   :  { %v628_v6 = vpop.f32.mrf.mxu1 }
 0x129   :  { %v629_v12 = vadd.f32 %v628_v6, %v1429_v2  ;;  %v792_v6 = vadd.f32 %v984_v57, %v1302_v27  ;;  %v477_v27 = vadd.f32 %v1389_v10, %v1404_v24  ;;  %v556_v57 = vadd.f32 %v1387_v23, %v1416_v38 }
 0x12a   :  { %v1436_v4 = vpop.f32.mrf.mxu2 }
 0x12b   :  { %v669_v14 = vpop.f32.mrf.mxu3  ;;  %v597_v23 = vadd.f32 %v1393_v37, %v556_v57  ;;  %v559_v37 = vadd.f32 %v1395_v40, %v1416_v38 }
 0x12c   :  { %v670_v19 = vadd.f32 %v669_v14, %v629_v12  ;;  %v594_v14 = vadd.f32 %v1385_v61, %v553_v63 }
 0x12e   :  { %v807_v29 = vadd.f32 %v791_v21, %v670_v19  ;;  %991 = vtanh.f32 %v594_v14 }
 0x12f   :  { %v710_v52 = vpop.f32.mrf.mxu0 }
 0x130   :  { %v823_v39 = vmul.f32 0.33333334, %v807_v29  ;;  %v711_v60 = vadd.f32 %v710_v52, %v1440_v26  ;;  %v631_v1 = vpop.f32.mrf.mxu1 }
 0x131   :  { %v632_v9 = vadd.f32 %v631_v1, %v1429_v2 }
 0x132   :  { %vm839_vm1 = vcmp.gt.f32.partialorder %v823_v39, 0.0  ;;  %v855_v20 = vmul.f32 0.2, %v823_v39  ;;  %v751_v32 = vpop.f32.mrf.mxu2 }
 0x133   :  { %v672_v31 = vpop.f32.mrf.mxu3  ;;  %v752_v16 = vadd.f32 %v751_v32, %v711_v60  ;;  %v990_v32 = vpop.eup %989 }
 0x134   :  { %v871_v34 = vsel %vm839_vm1, %v823_v39, %v855_v20  ;;  %v673_v12 = vadd.f32 %v672_v31, %v632_v9  ;;  %v794_v9 = vadd.f32 %v988_v30, %v1314_v33  ;;  %v518_v31 = vadd.f32 %v1391_v18, %v477_v27  ;;  %v992_v7 = vpop.eup %991 }
 0x135   :  { %887 = vst [vmem:[#allocation8] sm:$0xff] %v871_v34  ;;  %v808_v19 = vadd.f32 %v792_v6, %v752_v16  ;;  %v480_v16 = vadd.f32 %v1397_v42, %v1404_v24 }
 0x136   :  { %v809_v15 = vadd.f32 %v793_v3, %v673_v12  ;;  %v795_v3 = vadd.f32 %v986_v28, %v1321_v36  ;;  %993 = vtanh.f32 %v518_v31  ;;  %v796_v28 = vadd.f32 %v992_v7, %v1326_v41 }
 0x137   :  { %v713_v21 = vpop.f32.mrf.mxu0  ;;  %v824_v49 = vmul.f32 0.33333334, %v808_v19  ;;  %v797_v19 = vadd.f32 %v990_v32, %v1333_v44  ;;  %995 = vtanh.f32 %v597_v23  ;;  %v600_v41 = vadd.f32 %v1401_v11, %v559_v37 }
 0x138   :  { %v825_v29 = vmul.f32 0.33333334, %v809_v15  ;;  %v714_v52 = vadd.f32 %v713_v21, %v1440_v26  ;;  %v634_v35 = vpop.f32.mrf.mxu1  ;;  %v562_v31 = vadd.f32 %v1406_v46, %v1416_v38 }
 0x139   :  { %vm840_vm3 = vcmp.gt.f32.partialorder %v824_v49, 0.0  ;;  %v856_v61 = vmul.f32 0.2, %v824_v49  ;;  %v635_v13 = vadd.f32 %v634_v35, %v1429_v2 }
 0x13a   :  { %vm841_vm2 = vcmp.gt.f32.partialorder %v825_v29, 0.0  ;;  %v857_v45 = vmul.f32 0.2, %v825_v29  ;;  %v754_v60 = vpop.f32.mrf.mxu2  ;;  %v603_v46 = vadd.f32 %v1413_v25, %v562_v31  ;;  %v565_v25 = vadd.f32 %v1418_v55, %v1416_v38 }
 0x13b   :  { %v675_v39 = vpop.f32.mrf.mxu3  ;;  %v872_v1 = vsel %vm840_vm3, %v824_v49, %v856_v61  ;;  %v755_v20 = vadd.f32 %v754_v60, %v714_v52  ;;  %v521_v52 = vadd.f32 %v1399_v43, %v480_v16  ;;  %v483_v43 = vadd.f32 %v1408_v47, %v1404_v24 }
 0x13c   :  { %v873_v63 = vsel %vm841_vm2, %v825_v29, %v857_v45  ;;  %v676_v10 = vadd.f32 %v675_v39, %v635_v13  ;;  %888 = vst [vmem:[#allocation8 + $0x8] sm:$0xff] %v872_v1  ;;  %v994_v57 = vpop.eup %993 }
 0x13d   :  { %889 = vst [vmem:[#allocation8 + $0x10] sm:$0xff] %v873_v63  ;;  %v810_v6 = vadd.f32 %v794_v9, %v755_v20  ;;  %997 = vtanh.f32 %v521_v52  ;;  %v996_v63 = vpop.eup %995  ;;  %v524_v16 = vadd.f32 %v1411_v50, %v483_v43 }
 0x13e   :  { %v811_v34 = vadd.f32 %v795_v3, %v676_v10  ;;  %999 = vtanh.f32 %v600_v41  ;;  %v798_v23 = vadd.f32 %v996_v63, %v1338_v48  ;;  %v486_v48 = vadd.f32 %v1421_v58, %v1404_v24 }
 0x13f   :  { %v716_v12 = vpop.f32.mrf.mxu0  ;;  %v826_v14 = vmul.f32 0.33333334, %v810_v6  ;;  %1001 = vtanh.f32 %v524_v16 }
 0x140   :  { %v717_v33 = vadd.f32 %v716_v12, %v1440_v26  ;;  %v827_v18 = vmul.f32 0.33333334, %v811_v34  ;;  %v637_v15 = vpop.f32.mrf.mxu1  ;;  %v799_v34 = vadd.f32 %v994_v57, %v1345_v51  ;;  %1003 = vtanh.f32 %v603_v46 }
 0x141   :  { %vm842_vm4 = vcmp.gt.f32.partialorder %v826_v14, 0.0  ;;  %v858_v36 = vmul.f32 0.2, %v826_v14  ;;  %v638_v21 = vadd.f32 %v637_v15, %v1429_v2 }
 0x142   :  { %vm843_vm5 = vcmp.gt.f32.partialorder %v827_v18, 0.0  ;;  %v859_v42 = vmul.f32 0.2, %v827_v18  ;;  %v757_v49 = vpop.f32.mrf.mxu2 }
 0x143   :  { %v678_v29 = vpop.f32.mrf.mxu3  ;;  %v874_v30 = vsel %vm842_vm4, %v826_v14, %v858_v36  ;;  %v758_v35 = vadd.f32 %v757_v49, %v717_v33  ;;  %v998_v12 = vpop.eup %997 }
 0x144   :  { %v679_v27 = vadd.f32 %v678_v29, %v638_v21  ;;  %v875_v44 = vsel %vm843_vm5, %v827_v18, %v859_v42  ;;  %890 = vst [vmem:[#allocation8 + $0x18] sm:$0xff] %v874_v30  ;;  %v1000_v36 = vpop.eup %999  ;;  %v801_v51 = vadd.f32 %v998_v12, %v1357_v59  ;;  %v527_v59 = vadd.f32 %v1424_v53, %v486_v48 }
 0x145   :  { %891 = vst [vmem:[#allocation8 + $0x20] sm:$0xff] %v875_v44  ;;  %v812_v61 = vadd.f32 %v796_v28, %v758_v35  ;;  %v800_v58 = vadd.f32 %v1000_v36, %v1350_v56  ;;  %v1002_v55 = vpop.eup %1001 }
 0x146   :  { %v813_v45 = vadd.f32 %v797_v19, %v679_v27  ;;  %1005 = vtanh.f32 %v527_v59 }
 0x147   :  { %v719_v13 = vpop.f32.mrf.mxu0  ;;  %v828_v39 = vmul.f32 0.33333334, %v812_v61 }
 0x148   :  { %v829_v40 = vmul.f32 0.33333334, %v813_v45  ;;  %v720_v60 = vadd.f32 %v719_v13, %v1440_v26  ;;  %v640_v1 = vpop.f32.mrf.mxu1  ;;  %v606_v45 = vadd.f32 %v1426_v62, %v565_v25 }
 0x149   :  { %vm844_vm7 = vcmp.gt.f32.partialorder %v828_v39, 0.0  ;;  %v860_v9 = vmul.f32 0.2, %v828_v39  ;;  %v641_v11 = vadd.f32 %v640_v1, %v1429_v2 }
 0x14a   :  { %vm845_vm6 = vcmp.gt.f32.partialorder %v829_v40, 0.0  ;;  %v861_v20 = vmul.f32 0.2, %v829_v40  ;;  %v760_v3 = vpop.f32.mrf.mxu2  ;;  %1007 = vtanh.f32 %v606_v45 }
 0x14b   :  { %v681_v10 = vpop.f32.mrf.mxu3  ;;  %v876_v6 = vsel %vm844_vm7, %v828_v39, %v860_v9  ;;  %v761_v7 = vadd.f32 %v760_v3, %v720_v60  ;;  %v568_v60 = vadd.f32 %v1431_v54, %v1416_v38 }
 0x14c   :  { %v877_v32 = vsel %vm845_vm6, %v829_v40, %v861_v20  ;;  %v682_v47 = vadd.f32 %v681_v10, %v641_v11  ;;  %892 = vst [vmem:[#allocation8 + $0x28] sm:$0xff] %v876_v6  ;;  %v1004_v40 = vpop.eup %1003  ;;  %v803_v10 = vadd.f32 %v1002_v55, %v1369_v5 }
 0x14d   :  { %893 = vst [vmem:[#allocation8 + $0x30] sm:$0xff] %v877_v32  ;;  %v814_v14 = vadd.f32 %v798_v23, %v761_v7  ;;  %v802_v31 = vadd.f32 %v1004_v40, %v1362_v0  ;;  %v1006_v32 = vpop.eup %1005  ;;  %v609_v6 = vadd.f32 %v1436_v4, %v568_v60 }
 0x14e   :  { %v815_v33 = vadd.f32 %v799_v34, %v682_v47  ;;  %v805_v46 = vadd.f32 %v1006_v32, %v1379_v17 }
 0x14f   :  { %v722_v18 = vpop.f32.mrf.mxu0  ;;  %v830_v15 = vmul.f32 0.33333334, %v814_v14  ;;  %1009 = vtanh.f32 %v609_v6 }
 0x150   :  { %v723_v19 = vadd.f32 %v722_v18, %v1440_v26  ;;  %v831_v21 = vmul.f32 0.33333334, %v815_v33  ;;  %v643_v28 = vpop.f32.mrf.mxu1  ;;  %v1008_v47 = vpop.eup %1007 }
 0x151   :  { %vm846_vm8 = vcmp.gt.f32.partialorder %v830_v15, 0.0  ;;  %v862_v50 = vmul.f32 0.2, %v830_v15  ;;  %v644_v37 = vadd.f32 %v643_v28, %v1429_v2 }
 0x152   :  { %vm847_vm9 = vcmp.gt.f32.partialorder %v831_v21, 0.0  ;;  %v863_v42 = vmul.f32 0.2, %v831_v21  ;;  %v763_v49 = vpop.f32.mrf.mxu2 }
 0x153   :  { %v684_v29 = vpop.f32.mrf.mxu3  ;;  %v878_v52 = vsel %vm846_vm8, %v830_v15, %v862_v50  ;;  %v764_v24 = vadd.f32 %v763_v49, %v723_v19  ;;  %v804_v19 = vadd.f32 %v1008_v47, %v1374_v8 }
 0x154   :  { %v685_v30 = vadd.f32 %v684_v29, %v644_v37  ;;  %v879_v27 = vsel %vm847_vm9, %v831_v21, %v863_v42  ;;  %894 = vst [vmem:[#allocation8 + $0x38] sm:$0xff] %v878_v52 }
 0x155   :  { %895 = vst [vmem:[#allocation8 + $0x40] sm:$0xff] %v879_v27  ;;  %v816_v44 = vadd.f32 %v800_v58, %v764_v24  ;;  %v1010_v37 = vpop.eup %1009 }
 0x156   :  { %v817_v35 = vadd.f32 %v801_v51, %v685_v30  ;;  %v806_v8 = vadd.f32 %v1010_v37, %v1383_v22 }
 0x157   :  { %v725_v61 = vpop.f32.mrf.mxu0  ;;  %v832_v41 = vmul.f32 0.33333334, %v816_v44 }
 0x158   :  { %v833_v57 = vmul.f32 0.33333334, %v817_v35  ;;  %v726_v13 = vadd.f32 %v725_v61, %v1440_v26  ;;  %v646_v39 = vpop.f32.mrf.mxu1 }
 0x159   :  { %vm848_vm11 = vcmp.gt.f32.partialorder %v832_v41, 0.0  ;;  %v864_v53 = vmul.f32 0.2, %v832_v41  ;;  %v647_v63 = vadd.f32 %v646_v39, %v1429_v2 }
 0x15a   :  { %vm849_vm10 = vcmp.gt.f32.partialorder %v833_v57, 0.0  ;;  %v865_v56 = vmul.f32 0.2, %v833_v57  ;;  %v766_v43 = vpop.f32.mrf.mxu2 }
 0x15b   :  { %v687_v62 = vpop.f32.mrf.mxu3  ;;  %v880_v20 = vsel %vm848_vm11, %v832_v41, %v864_v53  ;;  %v767_v9 = vadd.f32 %v766_v43, %v726_v13 }
 0x15c   :  { %v881_v1 = vsel %vm849_vm10, %v833_v57, %v865_v56  ;;  %v688_v11 = vadd.f32 %v687_v62, %v647_v63  ;;  %896 = vst [vmem:[#allocation8 + $0x48] sm:$0xff] %v880_v20 }
 0x15d   :  { %897 = vst [vmem:[#allocation8 + $0x50] sm:$0xff] %v881_v1  ;;  %v818_v3 = vadd.f32 %v802_v31, %v767_v9 }
 0x15e   :  { %v819_v7 = vadd.f32 %v803_v10, %v688_v11 }
 0x15f   :  { %v728_v38 = vpop.f32.mrf.mxu0  ;;  %v834_v54 = vmul.f32 0.33333334, %v818_v3 }
 0x160   :  { %v729_v23 = vadd.f32 %v728_v38, %v1440_v26  ;;  %v835_v34 = vmul.f32 0.33333334, %v819_v7  ;;  %v649_v12 = vpop.f32.mrf.mxu1 }
 0x161   :  { %vm850_vm12 = vcmp.gt.f32.partialorder %v834_v54, 0.0  ;;  %v866_v16 = vmul.f32 0.2, %v834_v54  ;;  %v650_v0 = vadd.f32 %v649_v12, %v1429_v2 }
 0x162   :  { %vm851_vm13 = vcmp.gt.f32.partialorder %v835_v34, 0.0  ;;  %v867_v5 = vmul.f32 0.2, %v835_v34  ;;  %v769_v33 = vpop.f32.mrf.mxu2 }
 0x163   :  { %v690_v14 = vpop.f32.mrf.mxu3  ;;  %v882_v4 = vsel %vm850_vm12, %v834_v54, %v866_v16  ;;  %v770_v15 = vadd.f32 %v769_v33, %v729_v23 }
 0x164   :  { %v691_v18 = vadd.f32 %v690_v14, %v650_v0  ;;  %v883_v36 = vsel %vm851_vm13, %v835_v34, %v867_v5  ;;  %898 = vst [vmem:[#allocation8 + $0x58] sm:$0xff] %v882_v4 }
 0x165   :  { %899 = vst [vmem:[#allocation8 + $0x60] sm:$0xff] %v883_v36  ;;  %v820_v21 = vadd.f32 %v804_v19, %v770_v15 }
 0x166   :  { %v821_v48 = vadd.f32 %v805_v46, %v691_v18 }
 0x167   :  { %v731_v28 = vpop.f32.mrf.mxu0  ;;  %v836_v2 = vmul.f32 0.33333334, %v820_v21 }
 0x168   :  { %v837_v51 = vmul.f32 0.33333334, %v821_v48  ;;  %v732_v50 = vadd.f32 %v731_v28, %v1440_v26 }
 0x169   :  { %vm852_vm15 = vcmp.gt.f32.partialorder %v836_v2, 0.0  ;;  %v868_v17 = vmul.f32 0.2, %v836_v2 }
 0x16a   :  { %vm853_vm14 = vcmp.gt.f32.partialorder %v837_v51, 0.0  ;;  %v869_v25 = vmul.f32 0.2, %v837_v51  ;;  %v772_v42 = vpop.f32.mrf.mxu2 }
 0x16b   :  { %v884_v49 = vsel %vm852_vm15, %v836_v2, %v868_v17  ;;  %v773_v52 = vadd.f32 %v772_v42, %v732_v50 }
 0x16c   :  { %v885_v29 = vsel %vm853_vm14, %v837_v51, %v869_v25  ;;  %900 = vst [vmem:[#allocation8 + $0x68] sm:$0xff] %v884_v49 }
 0x16d   :  { %901 = vst [vmem:[#allocation8 + $0x70] sm:$0xff] %v885_v29  ;;  %v822_v30 = vadd.f32 %v806_v8, %v773_v52 }
 0x16f   :  { %v838_v24 = vmul.f32 0.33333334, %v822_v30 }
 0x171   :  { %vm854_vm0 = vcmp.gt.f32.partialorder %v838_v24, 0.0  ;;  %v870_v26 = vmul.f32 0.2, %v838_v24 }
 0x173   :  { %v886_v58 = vsel %vm854_vm0, %v838_v24, %v870_v26 }
 0x174   :  { %902 = vst [vmem:[#allocation8 + $0x78] sm:$0xff] %v886_v58 }
 0x175   :  { %915 = dma.vmem_to_hbm [thread:$0]  %s908_s29, 2048, %s910_s5, [#allocation4], %s1117_s24, %s1117_s24, %s1118_s25  }
 0x176   :  { %1111 = dma.done.wait [#allocation4], 2048  }
 0x177   :  { %1112 = vsyncadd [#allocation4], 4294965248 }
 0x178   :  { %920 = vsyncpa [#allocation3], 1 }
 0x179   :  { %921 = vsyncpa [#allocation6], 1 }
 0x17a   :  { %922 = vsyncpa [#allocation4], 1 }

</bundles_post_ra>
